<compile_context>
chip_gen: v7x
topology: tpu7x:2x2x1
jax: 0.10.0
libtpu: 0.0.40
codegen_flags: <defaults>
</compile_context>

<pallas_src>
import functools

import jax
import jax.numpy as jnp
from jax import lax
from jax.experimental import pallas as pl
from jax.experimental.pallas import tpu as pltpu


def _round_up(n: int, m: int) -> int:
    return -(-n // m) * m


def proto_net_kernel(xp_ref, w1_ref, b1_ref, w2_hbm_ref, b2_ref, out_ref,
                     w2_vmem, w2_sem, *, b_split):
    """One fused pass: shared MLP over [x ; prototypes], then Gram-form cdist."""
    # Kick off the w2 HBM->VMEM DMA immediately so it hides under the Linear1 matmul
    # (a grid-less pallas_call would otherwise expose this transfer before the body).
    w2_cp = pltpu.make_async_copy(w2_hbm_ref, w2_vmem, w2_sem)
    w2_cp.start()

    # ---- Linear1 + ReLU: bf16 MXU operands, f32 accumulate; bias/ReLU in f32 ----
    h = jnp.dot(xp_ref[...], w1_ref[...], preferred_element_type=jnp.float32)
    h = jnp.maximum(h + b1_ref[...], 0.0)
    # TODO(synk): nn.Dropout(0.5) is stochastic at train time; implemented as
    # eval-mode identity (the only deterministic forward semantics).

    # ---- Linear2 + ReLU: wait for w2 only now (DMA overlapped with Linear1) ----
    w2_cp.wait()
    h2 = jnp.dot(h.astype(jnp.bfloat16), w2_vmem[...],
                 preferred_element_type=jnp.float32)
    t = jnp.maximum(h2 + b2_ref[...], 0.0)                   # [B_pad + P_pad, H2] f32

    tx = t[:b_split]                                          # [B_pad, H2] (8-aligned split)
    tp = t[b_split:]                                          # [P_pad, H2]

    # ---- cdist via Gram identity: pairwise term stays on the MXU (bf16 operands) ----
    x_sq = jnp.sum(tx * tx, axis=-1, keepdims=True)           # [B_pad, 1]  (f32)
    p_sq = jnp.sum(tp * tp, axis=-1)[None, :]                 # [1, P_pad]  (f32)
    cross = lax.dot_general(tx.astype(jnp.bfloat16), tp.astype(jnp.bfloat16),
                            (((1,), (1,)), ((), ())),
                            preferred_element_type=jnp.float32)  # [B_pad, P_pad]
    d2 = x_sq + p_sq - 2.0 * cross
    # Clamp: catastrophic cancellation can produce tiny negatives before sqrt.
    out_ref[...] = jnp.sqrt(jnp.maximum(d2, 0.0))


@jax.jit
def optimism_proto_net(x, prototypes, w1_bf, b1, w2_bf, b2):
    """x: [B, D] f32, prototypes: [P, D] f32, weights already bf16 -> distances [B, P] f32.

    Pad/cast/concat/slice are traced under the same jit as the pallas_call so they fuse
    into one dispatch. Weights must be pre-cast to bf16 ONCE outside this function
    (hoisted cast); do not pass f32 weights here on the hot path.
    """
    B, D = x.shape
    P = prototypes.shape[0]
    H, H2 = w2_bf.shape
    b_pad = _round_up(B, 8)
    p_pad = _round_up(P, 8)   # if P grows, round up to 128 for lane-dense output stores

    x_b = jnp.pad(x.astype(jnp.bfloat16), ((0, b_pad - B), (0, 0)))
    p_b = jnp.pad(prototypes.astype(jnp.bfloat16), ((0, p_pad - P), (0, 0)))
    xp = jnp.concatenate([x_b, p_b], axis=0)                  # [B_pad + P_pad, D] bf16

    vmem = pl.BlockSpec(memory_space=pltpu.MemorySpace.VMEM)
    kernel = functools.partial(proto_net_kernel, b_split=b_pad)
    out = pl.pallas_call(
        kernel,
        out_shape=jax.ShapeDtypeStruct((b_pad, p_pad), jnp.float32),
        in_specs=[vmem,                                   # xp
                  vmem,                                   # w1 (auto-DMA'd to VMEM)
                  vmem,                                   # b1
                  pl.BlockSpec(memory_space=pl.ANY),      # w2 raw ref, manual DMA
                  vmem],                                  # b2
        out_specs=vmem,
        scratch_shapes=[pltpu.VMEM((H, H2), jnp.bfloat16),     # w2 landing buffer
                        pltpu.SemaphoreType.DMA(())],          # w2 DMA completion sem
    )(xp, w1_bf, b1, w2_bf, b2)
    return out[:B, :P]


def init_params(key, input_size, hidden_size):
    """Deterministic synthetic parameters (nn.Linear shapes, stored as [in, out], f32)."""
    h2 = hidden_size // 2
    k1, k2, k3, k4 = jax.random.split(key, 4)
    w1 = jax.random.normal(k1, (input_size, hidden_size), jnp.float32) * 0.02
    b1 = jax.random.normal(k2, (1, hidden_size), jnp.float32) * 0.02
    w2 = jax.random.normal(k3, (hidden_size, h2), jnp.float32) * 0.02
    b2 = jax.random.normal(k4, (1, h2), jnp.float32) * 0.02
    return w1, b1, w2, b2


def prepare_params(w1, b1, w2, b2):
    """One-time weight preparation: cast matmul weights to bf16 (hoisted out of the
    per-inference path so the kernel streams ~1 MiB of bf16, not 2 MiB f32 + converts)."""
    return (jax.block_until_ready(w1.astype(jnp.bfloat16)), b1,
            jax.block_until_ready(w2.astype(jnp.bfloat16)), b2)


def reference_bf16(x, prototypes, w1, b1, w2, b2):
    """Pure-JAX reference matching the kernel's bf16-operand / f32-accumulate MLP math
    (direct-difference cdist, so it also bounds the Gram-form error)."""
    w1_bf = w1.astype(jnp.bfloat16)
    w2_bf = w2.astype(jnp.bfloat16)

    def mlp(a):
        h = jnp.dot(a.astype(jnp.bfloat16), w1_bf, preferred_element_type=jnp.float32)
        h = jnp.maximum(h + b1, 0.0)
        h2 = jnp.dot(h.astype(jnp.bfloat16), w2_bf, preferred_element_type=jnp.float32)
        return jnp.maximum(h2 + b2, 0.0)

    tx, tp = mlp(x), mlp(prototypes)
    d = tx[:, None, :] - tp[None, :, :]
    return jnp.sqrt(jnp.sum(d * d, axis=-1))


def reference_f32(x, prototypes, w1, b1, w2, b2):
    """Full-precision reference (matches the PyTorch module's f32 math)."""
    def mlp(a):
        h = jnp.maximum(a @ w1 + b1, 0.0)
        return jnp.maximum(h @ w2 + b2, 0.0)

    tx, tp = mlp(x), mlp(prototypes)
    d = tx[:, None, :] - tp[None, :, :]
    return jnp.sqrt(jnp.sum(d * d, axis=-1))


if __name__ == "__main__":
    # Module-defined sizes: input_size=768, hidden_size=512 (hidden//2 = 256).
    INPUT_SIZE = 768
    HIDDEN_SIZE = 512
    BATCH = 4          # batch of BERT mean-pooled sentence embeddings (synthetic here)
    NUM_PROTOS = 5     # very_low .. very_high optimism prototypes

    key = jax.random.PRNGKey(0)
    kx, kp, kw = jax.random.split(key, 3)

    x = jax.random.normal(kx, (BATCH, INPUT_SIZE), jnp.float32)
    prototypes = jax.random.normal(kp, (NUM_PROTOS, INPUT_SIZE), jnp.float32)
    w1, b1, w2, b2 = init_params(kw, INPUT_SIZE, HIDDEN_SIZE)

    # Hoisted, one-time bf16 weight cast (NOT part of the per-call path).
    w1_bf, b1_p, w2_bf, b2_p = prepare_params(w1, b1, w2, b2)

    dists = optimism_proto_net(x, prototypes, w1_bf, b1_p, w2_bf, b2_p)
    dists = jax.block_until_ready(dists)
    assert dists.shape == (BATCH, NUM_PROTOS)
    assert bool(jnp.all(jnp.isfinite(dists)))

    # Check vs. a reference using the same bf16-operand / f32-accumulate MLP math.
    ref_b = reference_bf16(x, prototypes, w1, b1, w2, b2)
    assert jnp.allclose(dists, ref_b, rtol=1e-2, atol=1e-2), "mismatch vs bf16 reference"

    # Loose check vs. the full-f32 module semantics (bf16 MXU operands shift results slightly).
    ref_f = reference_f32(x, prototypes, w1, b1, w2, b2)
    assert jnp.allclose(dists, ref_f, rtol=5e-2, atol=5e-2), "mismatch vs f32 reference"

    print("KERNEL_OK")
</pallas_src>

<mosaic_0001>
module attributes {stable_mosaic.version = 11 : i64} {
  func.func @proto_net_kernel(%arg0: memref<16x768xbf16, #tpu.memory_space<vmem>>, %arg1: memref<768x512xbf16, #tpu.memory_space<vmem>>, %arg2: memref<1x512xf32, #tpu.memory_space<vmem>>, %arg3: memref<512x256xbf16, #tpu.memory_space<any>>, %arg4: memref<1x256xf32, #tpu.memory_space<vmem>>, %arg5: memref<8x8xf32, #tpu.memory_space<vmem>>, %arg6: memref<512x256xbf16, #tpu.memory_space<vmem>>, %arg7: memref<!tpu.dma_semaphore, #tpu.memory_space<semaphore_mem>>) attributes {dimension_semantics = [], scalar_prefetch = 0 : i64, scratch_operands = 2 : i64, tpu.core_type = #tpu.core_type<tc>} {
    tpu.enqueue_dma source(%arg3 : memref<512x256xbf16, #tpu.memory_space<any>>) target(%arg6 : memref<512x256xbf16, #tpu.memory_space<vmem>>) target_semaphore(%arg7 : memref<!tpu.dma_semaphore, #tpu.memory_space<semaphore_mem>>)
    %c0 = arith.constant 0 : index
    %c0_0 = arith.constant 0 : index
    %0 = vector.load %arg0[%c0, %c0_0] : memref<16x768xbf16, #tpu.memory_space<vmem>>, vector<16x768xbf16>
    %c0_1 = arith.constant 0 : index
    %c0_2 = arith.constant 0 : index
    %1 = vector.load %arg1[%c0_1, %c0_2] : memref<768x512xbf16, #tpu.memory_space<vmem>>, vector<768x512xbf16>
    %cst = arith.constant dense<0.000000e+00> : vector<16x512xf32>
    %2 = tpu.matmul %0, %1, %cst {dimension_numbers = #tpu.dot_dimension_numbers<[1], [0], [0], [1], [0, 0, 1, 1], [], []>} : vector<16x768xbf16>, vector<768x512xbf16>, vector<16x512xf32> -> vector<16x512xf32>
    %c0_3 = arith.constant 0 : index
    %c0_4 = arith.constant 0 : index
    %3 = vector.load %arg2[%c0_3, %c0_4] : memref<1x512xf32, #tpu.memory_space<vmem>>, vector<1x512xf32>
    %4 = vector.broadcast %3 : vector<1x512xf32> to vector<16x512xf32>
    %5 = arith.addf %2, %4 : vector<16x512xf32>
    %cst_5 = arith.constant 0.000000e+00 : f32
    %6 = vector.broadcast %cst_5 : f32 to vector<16x512xf32>
    %7 = arith.maximumf %5, %6 : vector<16x512xf32>
    tpu.wait_dma2 semaphore(%arg7 : memref<!tpu.dma_semaphore, #tpu.memory_space<semaphore_mem>>) src(%arg3 : memref<512x256xbf16, #tpu.memory_space<any>>) dst(%arg6 : memref<512x256xbf16, #tpu.memory_space<vmem>>)
    %8 = arith.truncf %7 : vector<16x512xf32> to vector<16x512xbf16>
    %c0_6 = arith.constant 0 : index
    %c0_7 = arith.constant 0 : index
    %9 = vector.load %arg6[%c0_6, %c0_7] : memref<512x256xbf16, #tpu.memory_space<vmem>>, vector<512x256xbf16>
    %cst_8 = arith.constant dense<0.000000e+00> : vector<16x256xf32>
    %10 = tpu.matmul %8, %9, %cst_8 {dimension_numbers = #tpu.dot_dimension_numbers<[1], [0], [0], [1], [0, 0, 1, 1], [], []>} : vector<16x512xbf16>, vector<512x256xbf16>, vector<16x256xf32> -> vector<16x256xf32>
    %c0_9 = arith.constant 0 : index
    %c0_10 = arith.constant 0 : index
    %11 = vector.load %arg4[%c0_9, %c0_10] : memref<1x256xf32, #tpu.memory_space<vmem>>, vector<1x256xf32>
    %12 = vector.broadcast %11 : vector<1x256xf32> to vector<16x256xf32>
    %13 = arith.addf %10, %12 : vector<16x256xf32>
    %cst_11 = arith.constant 0.000000e+00 : f32
    %14 = vector.broadcast %cst_11 : f32 to vector<16x256xf32>
    %15 = arith.maximumf %13, %14 : vector<16x256xf32>
    %16 = vector.extract_strided_slice %15 {offsets = [0, 0], sizes = [8, 256], strides = [1, 1]} : vector<16x256xf32> to vector<8x256xf32>
    %17 = vector.extract_strided_slice %15 {offsets = [8, 0], sizes = [8, 256], strides = [1, 1]} : vector<16x256xf32> to vector<8x256xf32>
    %18 = arith.mulf %16, %16 : vector<8x256xf32>
    %cst_12 = arith.constant dense<0.000000e+00> : vector<8xf32>
    %19 = vector.multi_reduction <add>, %18, %cst_12 [1] : vector<8x256xf32> to vector<8xf32>
    %20 = vector.shape_cast %19 : vector<8xf32> to vector<8x1xf32>
    %21 = arith.mulf %17, %17 : vector<8x256xf32>
    %cst_13 = arith.constant dense<0.000000e+00> : vector<8xf32>
    %22 = vector.multi_reduction <add>, %21, %cst_13 [1] : vector<8x256xf32> to vector<8xf32>
    %23 = vector.shape_cast %22 : vector<8xf32> to vector<1x8xf32>
    %24 = arith.truncf %16 : vector<8x256xf32> to vector<8x256xbf16>
    %25 = arith.truncf %17 : vector<8x256xf32> to vector<8x256xbf16>
    %cst_14 = arith.constant dense<0.000000e+00> : vector<8x8xf32>
    %26 = tpu.matmul %24, %25, %cst_14 {dimension_numbers = #tpu.dot_dimension_numbers<[1], [1], [0], [0], [0, 0, 1, 0], [], []>} : vector<8x256xbf16>, vector<8x256xbf16>, vector<8x8xf32> -> vector<8x8xf32>
    %27 = vector.broadcast %20 : vector<8x1xf32> to vector<8x8xf32>
    %28 = vector.broadcast %23 : vector<1x8xf32> to vector<8x8xf32>
    %29 = arith.addf %27, %28 : vector<8x8xf32>
    %cst_15 = arith.constant 2.000000e+00 : f32
    %30 = vector.broadcast %cst_15 : f32 to vector<8x8xf32>
    %31 = arith.mulf %30, %26 : vector<8x8xf32>
    %32 = arith.subf %29, %31 : vector<8x8xf32>
    %cst_16 = arith.constant 0.000000e+00 : f32
    %33 = vector.broadcast %cst_16 : f32 to vector<8x8xf32>
    %34 = arith.maximumf %32, %33 : vector<8x8xf32>
    %35 = math.sqrt %34 : vector<8x8xf32>
    %c0_17 = arith.constant 0 : index
    %c0_18 = arith.constant 0 : index
    %36 = vector.load %arg5[%c0_17, %c0_18] : memref<8x8xf32, #tpu.memory_space<vmem>>, vector<8x8xf32>
    tpu.vector_store %arg5[%c0_17, %c0_18], %35 {strides = array<i32>} : memref<8x8xf32, #tpu.memory_space<vmem>>, vector<8x8xf32>,
    return
  }
}

</mosaic_0001>

<bundles_post_ra>
// kernel: optimism_proto_net.1
= control target key start
LH: loop header
LB: loop body
LE: loop exit
PB: predicated region body
PF: predicated region fallthrough
CT: control target
= control target key end

     0   :  { %10 = vsyncpa [#allocation5], 0  ;;  %s2384_s18 = smov [#allocation4]   ;;  %s2533_s0 = inlined_call_operand.vmem [shape: bf16[16,768], index: 0, kind: input, shape index: {}]   ;;  %s2534_s1 = inlined_call_operand.hbm [shape: bf16[768,512], index: 1, kind: input, shape index: {}]   ;;  %s2535_s2 = inlined_call_operand.vmem [shape: f32[1,512], index: 2, kind: input, shape index: {}]   ;;  %s2536_s3 = inlined_call_operand.hbm [shape: bf16[512,256], index: 3, kind: input, shape index: {}]   ;;  %s2537_s4 = inlined_call_operand.vmem [shape: f32[1,256], index: 4, kind: input, shape index: {}]   ;;  %s2538_s5 = inlined_call_operand.vmem [shape: f32[8,8], index: 5, kind: output, shape index: {}]  }
   0x1   :  { %s18_s19 = sshll.u32 %s2384_s18, 4  ;;  %s2358_s22 = scalar_lea.hbm %s2534_s1, 24576  ;;  %s19_s19 = int_to_ptr.vmem [resolvable:$true] %s18_s19 }
   0x2   :  { %p2359_p0 = scmp.ne.s32.totalorder %s2534_s1, %s2358_s22  ;;  %p2362_p1 = scmp.lt.u32.totalorder %s2358_s22, %s2534_s1 }
   0x4   :  { %p2364_p2 = pnand %p2362_p1, %p2359_p0 }
   0x6   :  { %2367 = shalt.err (!%p2364_p2)
}
   0x7   :  { %s2368_s27 = scalar_lea.vmem %s19_s19, 24576  ;;  %p2373_p4 = scmp.lt.s32.totalorder %s19_s19, %s19_s19 }
   0x8   :  { %p2369_p3 = scmp.ne.s32.totalorder %s19_s19, %s2368_s27  ;;  %p2374_p5 = scmp.lt.s32.totalorder %s2368_s27, %s2368_s27 }
   0xa   :  { %p2375_p6 = por %p2374_p5, %p2373_p4 }
   0xc   :  { %p2376_p7 = pnand %p2375_p6, %p2369_p3 }
   0xe   :  { %2379 = shalt.err (!%p2376_p7)
}
   0xf   :  { %s2385_s28 = smov 256   ;;  %s2386_s29 = smov 16  }
  0x10   :  { %24 = dma.hbm_to_vmem [thread:$0]  %s2534_s1, 24576, %s19_s19, [#allocation5], %s2385_s28, %s2385_s28, %s2386_s29  }
  0x11   :  { %2380 = dma.done.wait [#allocation5], 24576  }
  0x12   :  { %2381 = vsyncadd [#allocation5], 4294942720  ;;  %s37_s7 = sld [smem:[#allocation0]]   ;;  %49 = sst [smem:[#allocation7]] %s2385_s28 }
  0x13   :  { %51 = sst [smem:[#allocation7 + $0x1]] %s2385_s28  ;;  %s2387_s8 = smov 2  }
  0x14   :  { %53 = sst [smem:[#allocation7 + $0x2]] %s2387_s8  ;;  %s2388_s9 = smov 64  }
  0x15   :  { %55 = sst [smem:[#allocation7 + $0x3]] %s2388_s9  ;;  %s2389_s10 = smov 128  }
  0x16   :  { %57 = sst [smem:[#allocation7 + $0x4]] %s2389_s10  ;;  %s2390_s11 = smov [#allocation2]  }
  0x17   :  { %s45_s12 = sshll.u32 %s2390_s11, 4  ;;  %59 = sst [smem:[#allocation7 + $0x5]] %s2387_s8  ;;  %s46_s12 = int_to_ptr.vmem [resolvable:$true] %s45_s12 }
  0x18   :  { %s1816_s13 = sshll.u32 %s37_s7, 26  ;;  %61 = sst [smem:[#allocation7 + $0x6]] %s2389_s10 }
  0x19   :  { %s1817_s14 = sadd.s32 134217728, %s1816_s13  ;;  %63 = sst [smem:[#allocation7 + $0x7]] %s2388_s9 }
  0x1a   :  { %s2391_s1 = smov 4   ;;  %s2392_s15 = smov [#allocation3]  }
  0x1b   :  { %65 = sst [smem:[#allocation7 + $0x8]] %s2391_s1  ;;  %s2393_s16 = smov [#allocation6]  }
  0x1c   :  { %67 = dma.general %s2536_s3, 8192, %s46_s12, %s2392_s15, %s2393_s16, [#allocation7], %s1817_s14, 0  }
  0x1d   :  { %v2059_v0 = vld [vmem:[#allocation4 + $0x4] ss:$16 sps:$4 sm:$0xff]   ;;  %v2063_v2 = vld [vmem:[#allocation4] ss:$16 sps:$4 sm:$0xff]  }
  0x1e   :  { %v2061_v1 = vld [vmem:[#allocation4 + $0x204] ss:$16 sps:$4 sm:$0xff]   ;;  %1278 = vmatprep.subr.bf16.mxu1 %v2059_v0  ;;  %v2064_v3 = vld [vmem:[#allocation4 + $0x200] ss:$16 sps:$4 sm:$0xff]  }
  0x1f   :  { %1321 = vmatprep.subr.bf16.mxu0 %v2061_v1  ;;  %v2065_v4 = vld [vmem:[#allocation4 + $0x24] ss:$16 sps:$4 sm:$0xff]   ;;  %1279 = vmatpush1.bf16.msra.mxu1 %v2063_v2  ;;  %v2069_v6 = vld [vmem:[#allocation4 + $0x20] ss:$16 sps:$4 sm:$0xff]  }
  0x20   :  { %1322 = vmatpush1.bf16.msra.mxu0 %v2064_v3  ;;  %v2067_v5 = vld [vmem:[#allocation4 + $0x224] ss:$16 sps:$4 sm:$0xff]   ;;  %1280 = vmatprep.subr.bf16.mxu1 %v2065_v4  ;;  %v2070_v7 = vld [vmem:[#allocation4 + $0x220] ss:$16 sps:$4 sm:$0xff]   ;;  %v2166_v3 = vld [vmem:[#allocation4 + $0xc] ss:$16 sps:$4 sm:$0xff]  }
  0x21   :  { %1323 = vmatprep.subr.bf16.mxu0 %v2067_v5  ;;  %v2071_v8 = vld [vmem:[#allocation4 + $0x44] ss:$16 sps:$4 sm:$0xff]   ;;  %v2075_v10 = vld [vmem:[#allocation4 + $0x40] ss:$16 sps:$4 sm:$0xff]  }
  0x22   :  { %v2073_v9 = vld [vmem:[#allocation4 + $0x244] ss:$16 sps:$4 sm:$0xff]   ;;  %v2076_v11 = vld [vmem:[#allocation4 + $0x240] ss:$16 sps:$4 sm:$0xff]  }
  0x23   :  { %1281 = vmatpush1.bf16.msra.mxu1 %v2069_v6  ;;  %v2077_v12 = vld [vmem:[#allocation4 + $0x64] ss:$16 sps:$4 sm:$0xff]   ;;  %v2081_v14 = vld [vmem:[#allocation4 + $0x60] ss:$16 sps:$4 sm:$0xff]  }
  0x24   :  { %1324 = vmatpush1.bf16.msra.mxu0 %v2070_v7  ;;  %1282 = vmatprep.subr.bf16.mxu1 %v2071_v8  ;;  %v2079_v13 = vld [vmem:[#allocation4 + $0x264] ss:$16 sps:$4 sm:$0xff]   ;;  %v2082_v15 = vld [vmem:[#allocation4 + $0x260] ss:$16 sps:$4 sm:$0xff]   ;;  %v2164_v7 = vld [vmem:[#allocation4 + $0x8] ss:$16 sps:$4 sm:$0xff]  }
  0x25   :  { %1325 = vmatprep.subr.bf16.mxu0 %v2073_v9  ;;  %v2083_v16 = vld [vmem:[#allocation4 + $0x84] ss:$16 sps:$4 sm:$0xff]   ;;  %v2087_v18 = vld [vmem:[#allocation4 + $0x80] ss:$16 sps:$4 sm:$0xff]   ;;  %v2172_v9 = vld [vmem:[#allocation4 + $0x2c] ss:$16 sps:$4 sm:$0xff]  }
  0x26   :  { %v2085_v17 = vld [vmem:[#allocation4 + $0x284] ss:$16 sps:$4 sm:$0xff]   ;;  %v2088_v19 = vld [vmem:[#allocation4 + $0x280] ss:$16 sps:$4 sm:$0xff]  }
  0x27   :  { %1283 = vmatpush1.bf16.msra.mxu1 %v2075_v10  ;;  %v2089_v20 = vld [vmem:[#allocation4 + $0xa4] ss:$16 sps:$4 sm:$0xff]   ;;  %v2093_v22 = vld [vmem:[#allocation4 + $0xa0] ss:$16 sps:$4 sm:$0xff]  }
  0x28   :  { %1326 = vmatpush1.bf16.msra.mxu0 %v2076_v11  ;;  %1284 = vmatprep.subr.bf16.mxu1 %v2077_v12  ;;  %v2091_v21 = vld [vmem:[#allocation4 + $0x2a4] ss:$16 sps:$4 sm:$0xff]   ;;  %v2094_v23 = vld [vmem:[#allocation4 + $0x2a0] ss:$16 sps:$4 sm:$0xff]   ;;  %v2170_v11 = vld [vmem:[#allocation4 + $0x28] ss:$16 sps:$4 sm:$0xff]  }
  0x29   :  { %1327 = vmatprep.subr.bf16.mxu0 %v2079_v13  ;;  %v2095_v24 = vld [vmem:[#allocation4 + $0xc4] ss:$16 sps:$4 sm:$0xff]   ;;  %v2099_v26 = vld [vmem:[#allocation4 + $0xc0] ss:$16 sps:$4 sm:$0xff]   ;;  %v2178_v13 = vld [vmem:[#allocation4 + $0x4c] ss:$16 sps:$4 sm:$0xff]  }
  0x2a   :  { %v2097_v25 = vld [vmem:[#allocation4 + $0x2c4] ss:$16 sps:$4 sm:$0xff]   ;;  %v2100_v27 = vld [vmem:[#allocation4 + $0x2c0] ss:$16 sps:$4 sm:$0xff]  }
  0x2b   :  { %1285 = vmatpush1.bf16.msra.mxu1 %v2081_v14  ;;  %v2101_v28 = vld [vmem:[#allocation4 + $0xe4] ss:$16 sps:$4 sm:$0xff]   ;;  %v2105_v30 = vld [vmem:[#allocation4 + $0xe0] ss:$16 sps:$4 sm:$0xff]  }
  0x2c   :  { %1328 = vmatpush1.bf16.msra.mxu0 %v2082_v15  ;;  %1286 = vmatprep.subr.bf16.mxu1 %v2083_v16  ;;  %v2103_v29 = vld [vmem:[#allocation4 + $0x2e4] ss:$16 sps:$4 sm:$0xff]   ;;  %v2106_v31 = vld [vmem:[#allocation4 + $0x2e0] ss:$16 sps:$4 sm:$0xff]   ;;  %v2176_v15 = vld [vmem:[#allocation4 + $0x48] ss:$16 sps:$4 sm:$0xff]  }
  0x2d   :  { %1329 = vmatprep.subr.bf16.mxu0 %v2085_v17  ;;  %v2107_v32 = vld [vmem:[#allocation4 + $0x104] ss:$16 sps:$4 sm:$0xff]   ;;  %v2111_v34 = vld [vmem:[#allocation4 + $0x100] ss:$16 sps:$4 sm:$0xff]   ;;  %v2184_v17 = vld [vmem:[#allocation4 + $0x6c] ss:$16 sps:$4 sm:$0xff]  }
  0x2e   :  { %v2109_v33 = vld [vmem:[#allocation4 + $0x304] ss:$16 sps:$4 sm:$0xff]   ;;  %v2112_v35 = vld [vmem:[#allocation4 + $0x300] ss:$16 sps:$4 sm:$0xff]  }
  0x2f   :  { %1287 = vmatpush1.bf16.msra.mxu1 %v2087_v18  ;;  %v2113_v36 = vld [vmem:[#allocation4 + $0x124] ss:$16 sps:$4 sm:$0xff]   ;;  %v2117_v38 = vld [vmem:[#allocation4 + $0x120] ss:$16 sps:$4 sm:$0xff]  }
  0x30   :  { %1330 = vmatpush1.bf16.msra.mxu0 %v2088_v19  ;;  %1288 = vmatprep.subr.bf16.mxu1 %v2089_v20  ;;  %v2115_v37 = vld [vmem:[#allocation4 + $0x324] ss:$16 sps:$4 sm:$0xff]   ;;  %v2118_v39 = vld [vmem:[#allocation4 + $0x320] ss:$16 sps:$4 sm:$0xff]   ;;  %v2182_v19 = vld [vmem:[#allocation4 + $0x68] ss:$16 sps:$4 sm:$0xff]  }
  0x31   :  { %1331 = vmatprep.subr.bf16.mxu0 %v2091_v21  ;;  %v2119_v40 = vld [vmem:[#allocation4 + $0x144] ss:$16 sps:$4 sm:$0xff]   ;;  %v2123_v42 = vld [vmem:[#allocation4 + $0x140] ss:$16 sps:$4 sm:$0xff]   ;;  %v2190_v21 = vld [vmem:[#allocation4 + $0x8c] ss:$16 sps:$4 sm:$0xff]  }
  0x32   :  { %v2121_v41 = vld [vmem:[#allocation4 + $0x344] ss:$16 sps:$4 sm:$0xff]   ;;  %v2124_v43 = vld [vmem:[#allocation4 + $0x340] ss:$16 sps:$4 sm:$0xff]  }
  0x33   :  { %1289 = vmatpush1.bf16.msra.mxu1 %v2093_v22  ;;  %v2125_v44 = vld [vmem:[#allocation4 + $0x164] ss:$16 sps:$4 sm:$0xff]   ;;  %v2129_v46 = vld [vmem:[#allocation4 + $0x160] ss:$16 sps:$4 sm:$0xff]  }
  0x34   :  { %1332 = vmatpush1.bf16.msra.mxu0 %v2094_v23  ;;  %1290 = vmatprep.subr.bf16.mxu1 %v2095_v24  ;;  %v2127_v45 = vld [vmem:[#allocation4 + $0x364] ss:$16 sps:$4 sm:$0xff]   ;;  %v2130_v47 = vld [vmem:[#allocation4 + $0x360] ss:$16 sps:$4 sm:$0xff]   ;;  %v2188_v23 = vld [vmem:[#allocation4 + $0x88] ss:$16 sps:$4 sm:$0xff]  }
  0x35   :  { %1333 = vmatprep.subr.bf16.mxu0 %v2097_v25  ;;  %v2131_v48 = vld [vmem:[#allocation4 + $0x184] ss:$16 sps:$4 sm:$0xff]   ;;  %v2135_v52 = vld [vmem:[#allocation4 + $0x180] ss:$16 sps:$4 sm:$0xff]   ;;  %v2196_v25 = vld [vmem:[#allocation4 + $0xac] ss:$16 sps:$4 sm:$0xff]  }
  0x36   :  { %v2157_v49 = vld [vmem:[%s2533_s0 + $0x4] ss:$24 sps:$4 sm:$0xff]   ;;  %v2136_v53 = vld [vmem:[#allocation4 + $0x380] ss:$16 sps:$4 sm:$0xff]  }
  0x37   :  { %1291 = vmatpush1.bf16.msra.mxu1 %v2099_v26  ;;  %v2133_v50 = vld [vmem:[#allocation4 + $0x384] ss:$16 sps:$4 sm:$0xff]   ;;  %1310 = vmatprep.mubr.bf16.mxu1 %v2157_v49  ;;  %v2141_v56 = vld [vmem:[#allocation4 + $0x1a0] ss:$16 sps:$4 sm:$0xff]  }
  0x38   :  { %1334 = vmatpush1.bf16.msra.mxu0 %v2100_v27  ;;  %1292 = vmatprep.subr.bf16.mxu1 %v2101_v28  ;;  %v2445_v51 = vld [vmem:[%s2533_s0 + $0xc] ss:$24 sps:$4 sm:$0xff]   ;;  %v2142_v57 = vld [vmem:[#allocation4 + $0x3a0] ss:$16 sps:$4 sm:$0xff]   ;;  %v2194_v27 = vld [vmem:[#allocation4 + $0xa8] ss:$16 sps:$4 sm:$0xff]  }
  0x39   :  { %1335 = vmatprep.subr.bf16.mxu0 %v2103_v29  ;;  %1353 = vmatprep.mubr.bf16.mxu0 %v2445_v51  ;;  %v2137_v54 = vld [vmem:[#allocation4 + $0x1a4] ss:$16 sps:$4 sm:$0xff]   ;;  %v2147_v60 = vld [vmem:[#allocation4 + $0x1c0] ss:$16 sps:$4 sm:$0xff]   ;;  %v2202_v29 = vld [vmem:[#allocation4 + $0xcc] ss:$16 sps:$4 sm:$0xff]  }
  0x3a   :  { %v2139_v55 = vld [vmem:[#allocation4 + $0x3a4] ss:$16 sps:$4 sm:$0xff]   ;;  %v2148_v61 = vld [vmem:[#allocation4 + $0x3c0] ss:$16 sps:$4 sm:$0xff]  }
  0x3b   :  { %1293 = vmatpush1.bf16.msra.mxu1 %v2105_v30  ;;  %v2143_v58 = vld [vmem:[#allocation4 + $0x1c4] ss:$16 sps:$4 sm:$0xff]   ;;  %v2153_v0 = vld [vmem:[#allocation4 + $0x1e0] ss:$16 sps:$4 sm:$0xff]  }
  0x3c   :  { %1336 = vmatpush1.bf16.msra.mxu0 %v2106_v31  ;;  %1294 = vmatprep.subr.bf16.mxu1 %v2107_v32  ;;  %v2145_v59 = vld [vmem:[#allocation4 + $0x3c4] ss:$16 sps:$4 sm:$0xff]   ;;  %v2154_v1 = vld [vmem:[#allocation4 + $0x3e0] ss:$16 sps:$4 sm:$0xff]   ;;  %v2200_v31 = vld [vmem:[#allocation4 + $0xc8] ss:$16 sps:$4 sm:$0xff]  }
  0x3d   :  { %1337 = vmatprep.subr.bf16.mxu0 %v2109_v33  ;;  %v2149_v62 = vld [vmem:[#allocation4 + $0x1e4] ss:$16 sps:$4 sm:$0xff]   ;;  %v2451_v4 = vld [vmem:[%s2533_s0] ss:$24 sps:$4 sm:$0xff]   ;;  %v2208_v33 = vld [vmem:[#allocation4 + $0xec] ss:$16 sps:$4 sm:$0xff]  }
  0x3e   :  { %v2151_v63 = vld [vmem:[#allocation4 + $0x3e4] ss:$16 sps:$4 sm:$0xff]   ;;  %v2456_v5 = vld [vmem:[%s2533_s0 + $0x8] ss:$24 sps:$4 sm:$0xff]  }
  0x3f   :  { %1295 = vmatpush1.bf16.msra.mxu1 %v2111_v34  ;;  %v2163_v2 = vld [vmem:[#allocation4 + $0x404] ss:$16 sps:$4 sm:$0xff]   ;;  %v2161_v6 = vld [vmem:[#allocation4 + $0x400] ss:$16 sps:$4 sm:$0xff]  }
  0x40   :  { %1338 = vmatpush1.bf16.msra.mxu0 %v2112_v35  ;;  %1296 = vmatprep.subr.bf16.mxu1 %v2113_v36  ;;  %v2169_v8 = vld [vmem:[#allocation4 + $0x424] ss:$16 sps:$4 sm:$0xff]   ;;  %v2167_v10 = vld [vmem:[#allocation4 + $0x420] ss:$16 sps:$4 sm:$0xff]   ;;  %v2206_v36 = vld [vmem:[#allocation4 + $0xe8] ss:$16 sps:$4 sm:$0xff]  }
  0x41   :  { %1339 = vmatprep.subr.bf16.mxu0 %v2115_v37  ;;  %v2175_v12 = vld [vmem:[#allocation4 + $0x444] ss:$16 sps:$4 sm:$0xff]   ;;  %v2173_v14 = vld [vmem:[#allocation4 + $0x440] ss:$16 sps:$4 sm:$0xff]  }
  0x42   :  { %v2181_v16 = vld [vmem:[#allocation4 + $0x464] ss:$16 sps:$4 sm:$0xff]   ;;  %v2179_v18 = vld [vmem:[#allocation4 + $0x460] ss:$16 sps:$4 sm:$0xff]  }
  0x43   :  { %1297 = vmatpush1.bf16.msra.mxu1 %v2117_v38  ;;  %v2187_v20 = vld [vmem:[#allocation4 + $0x484] ss:$16 sps:$4 sm:$0xff]   ;;  %v2185_v22 = vld [vmem:[#allocation4 + $0x480] ss:$16 sps:$4 sm:$0xff]   ;;  %v2214_v38 = vld [vmem:[#allocation4 + $0x10c] ss:$16 sps:$4 sm:$0xff]  }
  0x44   :  { %1340 = vmatpush1.bf16.msra.mxu0 %v2118_v39  ;;  %1298 = vmatprep.subr.bf16.mxu1 %v2119_v40  ;;  %v2193_v24 = vld [vmem:[#allocation4 + $0x4a4] ss:$16 sps:$4 sm:$0xff]   ;;  %v2191_v26 = vld [vmem:[#allocation4 + $0x4a0] ss:$16 sps:$4 sm:$0xff]   ;;  %v2212_v40 = vld [vmem:[#allocation4 + $0x108] ss:$16 sps:$4 sm:$0xff]  }
  0x45   :  { %1341 = vmatprep.subr.bf16.mxu0 %v2121_v41  ;;  %v2199_v28 = vld [vmem:[#allocation4 + $0x4c4] ss:$16 sps:$4 sm:$0xff]   ;;  %v2197_v30 = vld [vmem:[#allocation4 + $0x4c0] ss:$16 sps:$4 sm:$0xff]  }
  0x46   :  { %v2205_v32 = vld [vmem:[#allocation4 + $0x4e4] ss:$16 sps:$4 sm:$0xff]   ;;  %v2203_v35 = vld [vmem:[#allocation4 + $0x4e0] ss:$16 sps:$4 sm:$0xff]  }
  0x47   :  { %1299 = vmatpush1.bf16.msra.mxu1 %v2123_v42  ;;  %v2463_v34 = vld [vmem:[%s2533_s0 + $0x14] ss:$24 sps:$4 sm:$0xff]   ;;  %v2209_v39 = vld [vmem:[#allocation4 + $0x500] ss:$16 sps:$4 sm:$0xff]  }
  0x48   :  { %1342 = vmatpush1.bf16.msra.mxu0 %v2124_v43  ;;  %1300 = vmatprep.subr.bf16.mxu1 %v2125_v44  ;;  %v2211_v37 = vld [vmem:[#allocation4 + $0x504] ss:$16 sps:$4 sm:$0xff]   ;;  %v2220_v42 = vld [vmem:[#allocation4 + $0x12c] ss:$16 sps:$4 sm:$0xff]   ;;  %v2215_v43 = vld [vmem:[#allocation4 + $0x520] ss:$16 sps:$4 sm:$0xff]  }
  0x49   :  { %1343 = vmatprep.subr.bf16.mxu0 %v2127_v45  ;;  %v2217_v41 = vld [vmem:[#allocation4 + $0x524] ss:$16 sps:$4 sm:$0xff]   ;;  %v2218_v44 = vld [vmem:[#allocation4 + $0x128] ss:$16 sps:$4 sm:$0xff]  }
  0x4a   :  { %v2223_v45 = vld [vmem:[#allocation4 + $0x544] ss:$16 sps:$4 sm:$0xff]  }
  0x4b   :  { %1301 = vmatpush1.bf16.msra.mxu1 %v2129_v46  ;;  %v2226_v46 = vld [vmem:[#allocation4 + $0x14c] ss:$16 sps:$4 sm:$0xff]  }
  0x4c   :  { %1344 = vmatpush1.bf16.msra.mxu0 %v2130_v47  ;;  %1302 = vmatprep.subr.bf16.mxu1 %v2131_v48  ;;  %v2221_v47 = vld [vmem:[#allocation4 + $0x540] ss:$16 sps:$4 sm:$0xff]   ;;  %v2224_v48 = vld [vmem:[#allocation4 + $0x148] ss:$16 sps:$4 sm:$0xff]  }
  0x4d   :  { %1345 = vmatprep.subr.bf16.mxu0 %v2133_v50  ;;  %v2232_v50 = vld [vmem:[#allocation4 + $0x16c] ss:$16 sps:$4 sm:$0xff]  }
  0x4f   :  { %1303 = vmatpush1.bf16.msra.mxu1 %v2135_v52  ;;  %v2227_v52 = vld [vmem:[#allocation4 + $0x560] ss:$16 sps:$4 sm:$0xff]  }
  0x50   :  { %1346 = vmatpush1.bf16.msra.mxu0 %v2136_v53  ;;  %1304 = vmatprep.subr.bf16.mxu1 %v2137_v54  ;;  %v2230_v53 = vld [vmem:[#allocation4 + $0x168] ss:$16 sps:$4 sm:$0xff]   ;;  %v2235_v54 = vld [vmem:[#allocation4 + $0x584] ss:$16 sps:$4 sm:$0xff]  }
  0x51   :  { %1347 = vmatprep.subr.bf16.mxu0 %v2139_v55  ;;  %v2238_v55 = vld [vmem:[#allocation4 + $0x18c] ss:$16 sps:$4 sm:$0xff]  }
  0x53   :  { %1305 = vmatpush1.bf16.msra.mxu1 %v2141_v56  ;;  %v2233_v56 = vld [vmem:[#allocation4 + $0x580] ss:$16 sps:$4 sm:$0xff]  }
  0x54   :  { %1348 = vmatpush1.bf16.msra.mxu0 %v2142_v57  ;;  %1306 = vmatprep.subr.bf16.mxu1 %v2143_v58  ;;  %v2236_v57 = vld [vmem:[#allocation4 + $0x188] ss:$16 sps:$4 sm:$0xff]   ;;  %v2241_v58 = vld [vmem:[#allocation4 + $0x5a4] ss:$16 sps:$4 sm:$0xff]  }
  0x55   :  { %1349 = vmatprep.subr.bf16.mxu0 %v2145_v59  ;;  %v2244_v59 = vld [vmem:[#allocation4 + $0x1ac] ss:$16 sps:$4 sm:$0xff]  }
  0x57   :  { %1307 = vmatpush1.bf16.msra.mxu1 %v2147_v60  ;;  %v2239_v60 = vld [vmem:[#allocation4 + $0x5a0] ss:$16 sps:$4 sm:$0xff]  }
  0x58   :  { %1350 = vmatpush1.bf16.msra.mxu0 %v2148_v61  ;;  %1308 = vmatprep.subr.bf16.mxu1 %v2149_v62  ;;  %v2242_v61 = vld [vmem:[#allocation4 + $0x1a8] ss:$16 sps:$4 sm:$0xff]   ;;  %v2247_v62 = vld [vmem:[#allocation4 + $0x5c4] ss:$16 sps:$4 sm:$0xff]  }
  0x59   :  { %1351 = vmatprep.subr.bf16.mxu0 %v2151_v63  ;;  %v2250_v63 = vld [vmem:[#allocation4 + $0x1cc] ss:$16 sps:$4 sm:$0xff]  }
  0x5b   :  { %1309 = vmatpush1.bf16.msra.mxu1 %v2153_v0  ;;  %v2245_v0 = vld [vmem:[#allocation4 + $0x5c0] ss:$16 sps:$4 sm:$0xff]  }
  0x5c   :  { %1352 = vmatpush1.bf16.msra.mxu0 %v2154_v1  ;;  %1407 = vmatprep.subr.bf16.mxu1 %v2166_v3  ;;  %v2248_v1 = vld [vmem:[#allocation4 + $0x1c8] ss:$16 sps:$4 sm:$0xff]   ;;  %v2256_v3 = vld [vmem:[#allocation4 + $0x1ec] ss:$16 sps:$4 sm:$0xff]  }
  0x5d   :  { %1364 = vmatprep.subr.bf16.mxu0 %v2163_v2  ;;  %v2253_v2 = vld [vmem:[#allocation4 + $0x5e4] ss:$16 sps:$4 sm:$0xff]  }
  0x5e   :  { %1311 = vmatmul.mubr.bf16.vlgmr.msra.gmra.mrb[0].mxu1 %v2451_v4 }
  0x5f   :  { %1354 = vmatmul.mubr.bf16.vlgmr.msra.gmra.mrb[0].mxu0 %v2456_v5  ;;  %1408 = vmatpush1.bf16.msra.mxu1 %v2164_v7  ;;  %v2254_v7 = vld [vmem:[#allocation4 + $0x1e8] ss:$16 sps:$4 sm:$0xff]  }
  0x60   :  { %1365 = vmatpush1.bf16.msra.mxu0 %v2161_v6  ;;  %1409 = vmatprep.subr.bf16.mxu1 %v2172_v9  ;;  %v2251_v6 = vld [vmem:[#allocation4 + $0x5e0] ss:$16 sps:$4 sm:$0xff]  }
  0x61   :  { %1366 = vmatprep.subr.bf16.mxu0 %v2169_v8  ;;  %1439 = vmatprep.mubr.bf16.mxu1 %v2157_v49  ;;  %v2229_v49 = vld [vmem:[#allocation4 + $0x564] ss:$16 sps:$4 sm:$0xff]   ;;  %v2262_v8 = vld [vmem:[#allocation4 + $0x20c] ss:$16 sps:$4 sm:$0xff]   ;;  %v2469_v9 = vld [vmem:[%s2533_s0 + $0x10] ss:$24 sps:$4 sm:$0xff]  }
  0x62   :  { %1396 = vmatprep.mubr.bf16.mxu0 %v2463_v34 }
  0x63   :  { %1410 = vmatpush1.bf16.msra.mxu1 %v2170_v11  ;;  %v2265_v11 = vld [vmem:[#allocation4 + $0x22c] ss:$16 sps:$4 sm:$0xff]  }
  0x64   :  { %1367 = vmatpush1.bf16.msra.mxu0 %v2167_v10  ;;  %1411 = vmatprep.subr.bf16.mxu1 %v2178_v13  ;;  %v2260_v10 = vld [vmem:[#allocation4 + $0x208] ss:$16 sps:$4 sm:$0xff]   ;;  %v2268_v13 = vld [vmem:[#allocation4 + $0x24c] ss:$16 sps:$4 sm:$0xff]  }
  0x65   :  { %1368 = vmatprep.subr.bf16.mxu0 %v2175_v12  ;;  %v2263_v12 = vld [vmem:[#allocation4 + $0x228] ss:$16 sps:$4 sm:$0xff]  }
  0x67   :  { %1412 = vmatpush1.bf16.msra.mxu1 %v2176_v15  ;;  %v2271_v15 = vld [vmem:[#allocation4 + $0x26c] ss:$16 sps:$4 sm:$0xff]  }
  0x68   :  { %1369 = vmatpush1.bf16.msra.mxu0 %v2173_v14  ;;  %1413 = vmatprep.subr.bf16.mxu1 %v2184_v17  ;;  %v2266_v14 = vld [vmem:[#allocation4 + $0x248] ss:$16 sps:$4 sm:$0xff]   ;;  %v2274_v17 = vld [vmem:[#allocation4 + $0x28c] ss:$16 sps:$4 sm:$0xff]  }
  0x69   :  { %1370 = vmatprep.subr.bf16.mxu0 %v2181_v16  ;;  %v2269_v16 = vld [vmem:[#allocation4 + $0x268] ss:$16 sps:$4 sm:$0xff]  }
  0x6b   :  { %1414 = vmatpush1.bf16.msra.mxu1 %v2182_v19  ;;  %v2277_v19 = vld [vmem:[#allocation4 + $0x2ac] ss:$16 sps:$4 sm:$0xff]  }
  0x6c   :  { %1371 = vmatpush1.bf16.msra.mxu0 %v2179_v18  ;;  %1415 = vmatprep.subr.bf16.mxu1 %v2190_v21  ;;  %v2272_v18 = vld [vmem:[#allocation4 + $0x288] ss:$16 sps:$4 sm:$0xff]   ;;  %v2283_v21 = vld [vmem:[#allocation4 + $0x2ec] ss:$16 sps:$4 sm:$0xff]  }
  0x6d   :  { %1372 = vmatprep.subr.bf16.mxu0 %v2187_v20  ;;  %v2280_v20 = vld [vmem:[#allocation4 + $0x2cc] ss:$16 sps:$4 sm:$0xff]  }
  0x6f   :  { %1416 = vmatpush1.bf16.msra.mxu1 %v2188_v23  ;;  %v2286_v23 = vld [vmem:[#allocation4 + $0x30c] ss:$16 sps:$4 sm:$0xff]  }
  0x70   :  { %1373 = vmatpush1.bf16.msra.mxu0 %v2185_v22  ;;  %1417 = vmatprep.subr.bf16.mxu1 %v2196_v25  ;;  %v2281_v22 = vld [vmem:[#allocation4 + $0x2e8] ss:$16 sps:$4 sm:$0xff]   ;;  %v2289_v25 = vld [vmem:[#allocation4 + $0x32c] ss:$16 sps:$4 sm:$0xff]  }
  0x71   :  { %1374 = vmatprep.subr.bf16.mxu0 %v2193_v24  ;;  %v2284_v24 = vld [vmem:[#allocation4 + $0x308] ss:$16 sps:$4 sm:$0xff]  }
  0x73   :  { %1418 = vmatpush1.bf16.msra.mxu1 %v2194_v27  ;;  %v2292_v27 = vld [vmem:[#allocation4 + $0x34c] ss:$16 sps:$4 sm:$0xff]  }
  0x74   :  { %1375 = vmatpush1.bf16.msra.mxu0 %v2191_v26  ;;  %1419 = vmatprep.subr.bf16.mxu1 %v2202_v29  ;;  %v2287_v26 = vld [vmem:[#allocation4 + $0x328] ss:$16 sps:$4 sm:$0xff]   ;;  %v2295_v29 = vld [vmem:[#allocation4 + $0x36c] ss:$16 sps:$4 sm:$0xff]  }
  0x75   :  { %1376 = vmatprep.subr.bf16.mxu0 %v2199_v28  ;;  %v2290_v28 = vld [vmem:[#allocation4 + $0x348] ss:$16 sps:$4 sm:$0xff]  }
  0x77   :  { %1420 = vmatpush1.bf16.msra.mxu1 %v2200_v31  ;;  %v2298_v31 = vld [vmem:[#allocation4 + $0x38c] ss:$16 sps:$4 sm:$0xff]  }
  0x78   :  { %1377 = vmatpush1.bf16.msra.mxu0 %v2197_v30  ;;  %1421 = vmatprep.subr.bf16.mxu1 %v2208_v33  ;;  %v2293_v30 = vld [vmem:[#allocation4 + $0x368] ss:$16 sps:$4 sm:$0xff]   ;;  %v2301_v33 = vld [vmem:[#allocation4 + $0x3ac] ss:$16 sps:$4 sm:$0xff]  }
  0x79   :  { %1378 = vmatprep.subr.bf16.mxu0 %v2205_v32  ;;  %v2296_v32 = vld [vmem:[#allocation4 + $0x388] ss:$16 sps:$4 sm:$0xff]  }
  0x7b   :  { %1422 = vmatpush1.bf16.msra.mxu1 %v2206_v36  ;;  %v2304_v36 = vld [vmem:[#allocation4 + $0x3cc] ss:$16 sps:$4 sm:$0xff]  }
  0x7c   :  { %1379 = vmatpush1.bf16.msra.mxu0 %v2203_v35  ;;  %1423 = vmatprep.subr.bf16.mxu1 %v2214_v38  ;;  %v2299_v35 = vld [vmem:[#allocation4 + $0x3a8] ss:$16 sps:$4 sm:$0xff]   ;;  %v2307_v38 = vld [vmem:[#allocation4 + $0x3ec] ss:$16 sps:$4 sm:$0xff]  }
  0x7d   :  { %1380 = vmatprep.subr.bf16.mxu0 %v2211_v37  ;;  %v2302_v37 = vld [vmem:[#allocation4 + $0x3c8] ss:$16 sps:$4 sm:$0xff]  }
  0x7f   :  { %1424 = vmatpush1.bf16.msra.mxu1 %v2212_v40  ;;  %v2310_v40 = vld [vmem:[#allocation4 + $0x40c] ss:$16 sps:$4 sm:$0xff]  }
  0x80   :  { %1381 = vmatpush1.bf16.msra.mxu0 %v2209_v39  ;;  %1425 = vmatprep.subr.bf16.mxu1 %v2220_v42  ;;  %v2305_v39 = vld [vmem:[#allocation4 + $0x3e8] ss:$16 sps:$4 sm:$0xff]   ;;  %v2313_v42 = vld [vmem:[#allocation4 + $0x42c] ss:$16 sps:$4 sm:$0xff]  }
  0x81   :  { %1382 = vmatprep.subr.bf16.mxu0 %v2217_v41  ;;  %v2308_v41 = vld [vmem:[#allocation4 + $0x408] ss:$16 sps:$4 sm:$0xff]  }
  0x83   :  { %1426 = vmatpush1.bf16.msra.mxu1 %v2218_v44  ;;  %v2316_v44 = vld [vmem:[#allocation4 + $0x44c] ss:$16 sps:$4 sm:$0xff]  }
  0x84   :  { %1383 = vmatpush1.bf16.msra.mxu0 %v2215_v43  ;;  %1427 = vmatprep.subr.bf16.mxu1 %v2226_v46  ;;  %v2311_v43 = vld [vmem:[#allocation4 + $0x428] ss:$16 sps:$4 sm:$0xff]   ;;  %v2319_v46 = vld [vmem:[#allocation4 + $0x46c] ss:$16 sps:$4 sm:$0xff]  }
  0x85   :  { %1384 = vmatprep.subr.bf16.mxu0 %v2223_v45  ;;  %v2314_v45 = vld [vmem:[#allocation4 + $0x448] ss:$16 sps:$4 sm:$0xff]  }
  0x87   :  { %1428 = vmatpush1.bf16.msra.mxu1 %v2224_v48  ;;  %v2322_v48 = vld [vmem:[#allocation4 + $0x48c] ss:$16 sps:$4 sm:$0xff]  }
  0x88   :  { %1385 = vmatpush1.bf16.msra.mxu0 %v2221_v47  ;;  %1429 = vmatprep.subr.bf16.mxu1 %v2232_v50  ;;  %v2317_v47 = vld [vmem:[#allocation4 + $0x468] ss:$16 sps:$4 sm:$0xff]   ;;  %v2325_v50 = vld [vmem:[#allocation4 + $0x4ac] ss:$16 sps:$4 sm:$0xff]  }
  0x89   :  { %1386 = vmatprep.subr.bf16.mxu0 %v2229_v49  ;;  %v2320_v49 = vld [vmem:[#allocation4 + $0x488] ss:$16 sps:$4 sm:$0xff]  }
  0x8b   :  { %1430 = vmatpush1.bf16.msra.mxu1 %v2230_v53  ;;  %v2331_v53 = vld [vmem:[#allocation4 + $0x4ec] ss:$16 sps:$4 sm:$0xff]  }
  0x8c   :  { %1387 = vmatpush1.bf16.msra.mxu0 %v2227_v52  ;;  %1431 = vmatprep.subr.bf16.mxu1 %v2238_v55  ;;  %v2328_v52 = vld [vmem:[#allocation4 + $0x4cc] ss:$16 sps:$4 sm:$0xff]  }
  0x8d   :  { %1388 = vmatprep.subr.bf16.mxu0 %v2235_v54  ;;  %v2329_v54 = vld [vmem:[#allocation4 + $0x4e8] ss:$16 sps:$4 sm:$0xff]   ;;  %v2334_v55 = vld [vmem:[#allocation4 + $0x50c] ss:$16 sps:$4 sm:$0xff]  }
  0x8f   :  { %1432 = vmatpush1.bf16.msra.mxu1 %v2236_v57  ;;  %v2337_v57 = vld [vmem:[#allocation4 + $0x52c] ss:$16 sps:$4 sm:$0xff]  }
  0x90   :  { %1389 = vmatpush1.bf16.msra.mxu0 %v2233_v56  ;;  %1433 = vmatprep.subr.bf16.mxu1 %v2244_v59  ;;  %v2332_v56 = vld [vmem:[#allocation4 + $0x508] ss:$16 sps:$4 sm:$0xff]   ;;  %v2340_v59 = vld [vmem:[#allocation4 + $0x54c] ss:$16 sps:$4 sm:$0xff]  }
  0x91   :  { %1390 = vmatprep.subr.bf16.mxu0 %v2241_v58  ;;  %v2335_v58 = vld [vmem:[#allocation4 + $0x528] ss:$16 sps:$4 sm:$0xff]  }
  0x93   :  { %1434 = vmatpush1.bf16.msra.mxu1 %v2242_v61  ;;  %v2343_v61 = vld [vmem:[#allocation4 + $0x56c] ss:$16 sps:$4 sm:$0xff]  }
  0x94   :  { %1391 = vmatpush1.bf16.msra.mxu0 %v2239_v60  ;;  %1435 = vmatprep.subr.bf16.mxu1 %v2250_v63  ;;  %v2338_v60 = vld [vmem:[#allocation4 + $0x548] ss:$16 sps:$4 sm:$0xff]   ;;  %v2346_v63 = vld [vmem:[#allocation4 + $0x58c] ss:$16 sps:$4 sm:$0xff]  }
  0x95   :  { %1392 = vmatprep.subr.bf16.mxu0 %v2247_v62  ;;  %v2341_v62 = vld [vmem:[#allocation4 + $0x568] ss:$16 sps:$4 sm:$0xff]  }
  0x97   :  { %1436 = vmatpush1.bf16.msra.mxu1 %v2248_v1  ;;  %v2349_v1 = vld [vmem:[#allocation4 + $0x5ac] ss:$16 sps:$4 sm:$0xff]  }
  0x98   :  { %1393 = vmatpush1.bf16.msra.mxu0 %v2245_v0  ;;  %1437 = vmatprep.subr.bf16.mxu1 %v2256_v3  ;;  %v2344_v0 = vld [vmem:[#allocation4 + $0x588] ss:$16 sps:$4 sm:$0xff]   ;;  %v2352_v3 = vld [vmem:[#allocation4 + $0x5cc] ss:$16 sps:$4 sm:$0xff]  }
  0x99   :  { %1394 = vmatprep.subr.bf16.mxu0 %v2253_v2  ;;  %v2347_v2 = vld [vmem:[#allocation4 + $0x5a8] ss:$16 sps:$4 sm:$0xff]  }
  0x9b   :  { %1438 = vmatpush1.bf16.msra.mxu1 %v2254_v7  ;;  %v2355_v7 = vld [vmem:[#allocation4 + $0x5ec] ss:$16 sps:$4 sm:$0xff]  }
  0x9c   :  { %1395 = vmatpush1.bf16.msra.mxu0 %v2251_v6  ;;  %1450 = vmatprep.subr.bf16.mxu1 %v2262_v8  ;;  %v2350_v6 = vld [vmem:[#allocation4 + $0x5c8] ss:$16 sps:$4 sm:$0xff]  }
  0x9d   :  { %v2353_v8 = vld [vmem:[#allocation4 + $0x5e8] ss:$16 sps:$4 sm:$0xff]  }
  0x9e   :  { %1440 = vmatmul.mubr.bf16.vlgmr.msra.gmra.mrb[4].mxu1 %v2451_v4  ;;  %v2275_v4 = vld [vmem:[#allocation4 + $0x2a8] ss:$16 sps:$4 sm:$0xff]  }
  0x9f   :  { %1397 = vmatmul.mubr.bf16.vlgmr.msra.gmra.mrb[0].mxu0 %v2469_v9  ;;  %1451 = vmatpush1.bf16.msra.mxu1 %v2260_v10 }
  0xa0   :  { %1482 = vmatprep.mubr.bf16.mxu1 %v2445_v51  ;;  %1452 = vmatprep.subr.bf16.mxu1 %v2265_v11  ;;  %v2278_v51 = vld [vmem:[#allocation4 + $0x2c8] ss:$16 sps:$4 sm:$0xff]  }
  0xa3   :  { %1453 = vmatpush1.bf16.msra.mxu1 %v2263_v12 }
  0xa4   :  { %1454 = vmatprep.subr.bf16.mxu1 %v2268_v13 }
  0xa7   :  { %1455 = vmatpush1.bf16.msra.mxu1 %v2266_v14  ;;  %v268_v14 = vlaneseq }
  0xa8   :  { %1456 = vmatprep.subr.bf16.mxu1 %v2271_v15 }
  0xa9   :  { %v2478_v15 = vshrl.u32 %v268_v14, 7 }
  0xab   :  { %1457 = vmatpush1.bf16.msra.mxu1 %v2269_v16  ;;  %v270_v16 = vsub.s32 0, %v2478_v15 }
  0xac   :  { %1458 = vmatprep.subr.bf16.mxu1 %v2274_v17  ;;  %v266_v17 = vld [vmem:[%s2535_s2] sm:$0xf] }
  0xaf   :  { %1459 = vmatpush1.bf16.msra.mxu1 %v2272_v18  ;;  %v274_v18 = vsub.s32 1, %v2478_v15 }
  0xb0   :  { %1460 = vmatprep.subr.bf16.mxu1 %v2277_v19  ;;  %v271_v19 = vrot.slane %v266_v17, %v270_v16 }
  0xb3   :  { %1461 = vmatpush1.bf16.msra.mxu1 %v2275_v4 }
  0xb4   :  { %1462 = vmatprep.subr.bf16.mxu1 %v2280_v20 }
  0xb7   :  { %1463 = vmatpush1.bf16.msra.mxu1 %v2278_v51 }
  0xb8   :  { %1464 = vmatprep.subr.bf16.mxu1 %v2283_v21 }
  0xbb   :  { %1465 = vmatpush1.bf16.msra.mxu1 %v2281_v22 }
  0xbc   :  { %1466 = vmatprep.subr.bf16.mxu1 %v2286_v23 }
  0xbf   :  { %1467 = vmatpush1.bf16.msra.mxu1 %v2284_v24 }
  0xc0   :  { %1468 = vmatprep.subr.bf16.mxu1 %v2289_v25 }
  0xc3   :  { %1469 = vmatpush1.bf16.msra.mxu1 %v2287_v26 }
  0xc4   :  { %1470 = vmatprep.subr.bf16.mxu1 %v2292_v27 }
  0xc7   :  { %1471 = vmatpush1.bf16.msra.mxu1 %v2290_v28 }
  0xc8   :  { %1472 = vmatprep.subr.bf16.mxu1 %v2295_v29 }
  0xcb   :  { %1473 = vmatpush1.bf16.msra.mxu1 %v2293_v30 }
  0xcc   :  { %1474 = vmatprep.subr.bf16.mxu1 %v2298_v31 }
  0xcf   :  { %1475 = vmatpush1.bf16.msra.mxu1 %v2296_v32 }
  0xd0   :  { %1476 = vmatprep.subr.bf16.mxu1 %v2301_v33 }
  0xd3   :  { %1477 = vmatpush1.bf16.msra.mxu1 %v2299_v35  ;;  %v278_v35 = vsub.s32 2, %v2478_v15 }
  0xd4   :  { %1478 = vmatprep.subr.bf16.mxu1 %v2304_v36  ;;  %v282_v36 = vsub.s32 3, %v2478_v15 }
  0xd7   :  { %1479 = vmatpush1.bf16.msra.mxu1 %v2302_v37  ;;  %v279_v37 = vrot.slane %v266_v17, %v278_v35 }
  0xd8   :  { %1480 = vmatprep.subr.bf16.mxu1 %v2307_v38  ;;  %v283_v38 = vrot.slane %v266_v17, %v282_v36 }
  0xdb   :  { %1481 = vmatpush1.bf16.msra.mxu1 %v2305_v39 }
  0xdc   :  { %1493 = vmatprep.subr.bf16.mxu1 %v2310_v40 }
  0xde   :  { %1483 = vmatmul.mubr.bf16.vlgmr.msra.gmra.mrb[4].mxu1 %v2456_v5  ;;  %v2323_v5 = vld [vmem:[#allocation4 + $0x4a8] ss:$16 sps:$4 sm:$0xff]  }
  0xdf   :  { %1494 = vmatpush1.bf16.msra.mxu1 %v2308_v41  ;;  %1525 = vmatprep.mubr.bf16.mxu1 %v2463_v34  ;;  %v2326_v34 = vld [vmem:[#allocation4 + $0x4c8] ss:$16 sps:$4 sm:$0xff]  }
  0xe0   :  { %1495 = vmatprep.subr.bf16.mxu1 %v2313_v42 }
  0xe3   :  { %1496 = vmatpush1.bf16.msra.mxu1 %v2311_v43 }
  0xe4   :  { %1497 = vmatprep.subr.bf16.mxu1 %v2316_v44 }
  0xe7   :  { %1498 = vmatpush1.bf16.msra.mxu1 %v2314_v45 }
  0xe8   :  { %1499 = vmatprep.subr.bf16.mxu1 %v2319_v46 }
  0xeb   :  { %1500 = vmatpush1.bf16.msra.mxu1 %v2317_v47 }
  0xec   :  { %1501 = vmatprep.subr.bf16.mxu1 %v2322_v48 }
  0xef   :  { %1502 = vmatpush1.bf16.msra.mxu1 %v2320_v49 }
  0xf0   :  { %1503 = vmatprep.subr.bf16.mxu1 %v2325_v50 }
  0xf3   :  { %1504 = vmatpush1.bf16.msra.mxu1 %v2323_v5 }
  0xf4   :  { %1505 = vmatprep.subr.bf16.mxu1 %v2328_v52 }
  0xf7   :  { %1506 = vmatpush1.bf16.msra.mxu1 %v2326_v34 }
  0xf8   :  { %1507 = vmatprep.subr.bf16.mxu1 %v2331_v53 }
  0xfb   :  { %1508 = vmatpush1.bf16.msra.mxu1 %v2329_v54 }
  0xfc   :  { %1509 = vmatprep.subr.bf16.mxu1 %v2334_v55 }
  0xff   :  { %1510 = vmatpush1.bf16.msra.mxu1 %v2332_v56 }
 0x100   :  { %1511 = vmatprep.subr.bf16.mxu1 %v2337_v57 }
 0x103   :  { %1512 = vmatpush1.bf16.msra.mxu1 %v2335_v58 }
 0x104   :  { %1513 = vmatprep.subr.bf16.mxu1 %v2340_v59 }
 0x107   :  { %1514 = vmatpush1.bf16.msra.mxu1 %v2338_v60 }
 0x108   :  { %1515 = vmatprep.subr.bf16.mxu1 %v2343_v61 }
 0x10b   :  { %1516 = vmatpush1.bf16.msra.mxu1 %v2341_v62 }
 0x10c   :  { %1517 = vmatprep.subr.bf16.mxu1 %v2346_v63 }
 0x10f   :  { %1518 = vmatpush1.bf16.msra.mxu1 %v2344_v0 }
 0x110   :  { %1519 = vmatprep.subr.bf16.mxu1 %v2349_v1 }
 0x113   :  { %1520 = vmatpush1.bf16.msra.mxu1 %v2347_v2 }
 0x114   :  { %1521 = vmatprep.subr.bf16.mxu1 %v2352_v3 }
 0x117   :  { %1522 = vmatpush1.bf16.msra.mxu1 %v2350_v6 }
 0x118   :  { %1523 = vmatprep.subr.bf16.mxu1 %v2355_v7 }
 0x11b   :  { %1524 = vmatpush1.bf16.msra.mxu1 %v2353_v8 }
 0x11e   :  { %1526 = vmatmul.mubr.bf16.vlgmr.msra.gmra.mrb[4].mxu1 %v2469_v9  ;;  %v275_v9 = vrot.slane %v266_v17, %v274_v18 }
 0x131   :  { %v1312_v10 = vpop.f32.mrb[0].mxu1 }
 0x132   :  { %v1314_v11 = vpop.f32.mrb[1].mxu1  ;;  %v1313_v4 = vadd.f32 %v1312_v10, %v271_v19 }
 0x133   :  { %v1316_v12 = vpop.f32.mrb[2].mxu1  ;;  %v1315_v20 = vadd.f32 %v1314_v11, %v275_v9 }
 0x134   :  { %v1318_v13 = vpop.f32.mrb[3].mxu1  ;;  %v1317_v21 = vadd.f32 %v1316_v12, %v271_v19 }
 0x135   :  { %v1319_v24 = vadd.f32 %v1318_v13, %v275_v9 }
 0x172   :  { %v1398_v51 = vpop.f32.mrb[0].mxu0 }
 0x173   :  { %v2489_v22 = vadd.f32 %v1398_v51, %v1313_v4  ;;  %v1400_v23 = vpop.f32.mrb[1].mxu0 }
 0x174   :  { %v2020_v25 = vadd.f32 %v1400_v23, %v1315_v20  ;;  %v1402_v26 = vpop.f32.mrb[2].mxu0 }
 0x175   :  { %v1536_v27 = vmax.f32 %v2489_v22, 0.0  ;;  %v2492_v28 = vadd.f32 %v1402_v26, %v1317_v21  ;;  %v1404_v29 = vpop.f32.mrb[3].mxu0 }
 0x176   :  { %v1537_v30 = vmax.f32 %v2020_v25, 0.0  ;;  %v2024_v31 = vadd.f32 %v1404_v29, %v1319_v24 }
 0x177   :  { %v1540_v32 = vmax.f32 %v2492_v28, 0.0 }
 0x178   :  { %v1541_v33 = vmax.f32 %v2024_v31, 0.0 }
 0x1f1   :  { %v1527_v39 = vpop.f32.mrb[4].mxu1 }
 0x1f2   :  { %v2497_v40 = vadd.f32 %v1527_v39, %v279_v37  ;;  %v1529_v41 = vpop.f32.mrb[5].mxu1 }
 0x1f3   :  { %v2499_v42 = vadd.f32 %v1529_v41, %v283_v38  ;;  %v1531_v43 = vpop.f32.mrb[6].mxu1 }
 0x1f4   :  { %v1538_v44 = vmax.f32 %v2497_v40, 0.0  ;;  %v2502_v45 = vadd.f32 %v1531_v43, %v279_v37  ;;  %v1533_v46 = vpop.f32.mrb[7].mxu1 }
 0x1f5   :  { %v1539_v47 = vmax.f32 %v2499_v42, 0.0  ;;  %v2505_v48 = vadd.f32 %v1533_v46, %v283_v38 }
 0x1f6   :  { %v1542_v49 = vmax.f32 %v2502_v45, 0.0 }
 0x1f7   :  { %v1543_v50 = vmax.f32 %v2505_v48, 0.0 }
 0x1f8   :  { %2382 = dma.done.wait [#allocation3], 8192 }
 0x1f9   :  { %2383 = vsyncadd [#allocation3], 4294959104  ;;  %v1549_v5 = vpack.c.bf16 %v1541_v33, %v1537_v30  ;;  %v1553_v52 = vld [vmem:[#allocation2 + $0x8] sm:$0xff]  ;;  %v1552_v34 = vld [vmem:[#allocation2] sm:$0xff]  ;;  %v1548_v25 = vpack.c.bf16 %v1540_v32, %v1536_v27  ;;  %v1551_v26 = vpack.c.bf16 %v1543_v50, %v1539_v47  ;;  %vm1803_vm1 = vcmask 64512  }
 0x1fa   :  { %v1555_v53 = vld [vmem:[#allocation2 + $0x18] sm:$0xff]  ;;  %1628 = vmatprep.subr.bf16.mxu0 %v1553_v52  ;;  %v1554_v54 = vld [vmem:[#allocation2 + $0x10] sm:$0xff]  ;;  %v1557_v55 = vld [vmem:[#allocation2 + $0x28] sm:$0xff] }
 0x1fb   :  { %1660 = vmatprep.mubr.bf16.mxu0 %v1549_v5  ;;  %1629 = vmatpush1.bf16.msra.mxu0 %v1552_v34  ;;  %v1556_v56 = vld [vmem:[#allocation2 + $0x20] sm:$0xff]  ;;  %v1559_v57 = vld [vmem:[#allocation2 + $0x38] sm:$0xff]  ;;  %v1558_v58 = vld [vmem:[#allocation2 + $0x30] sm:$0xff] }
 0x1fc   :  { %1630 = vmatprep.subr.bf16.mxu0 %v1555_v53  ;;  %v1561_v59 = vld [vmem:[#allocation2 + $0x48] sm:$0xff]  ;;  %v1560_v60 = vld [vmem:[#allocation2 + $0x40] sm:$0xff]  ;;  %v1563_v61 = vld [vmem:[#allocation2 + $0x58] sm:$0xff] }
 0x1fd   :  { %v1562_v62 = vld [vmem:[#allocation2 + $0x50] sm:$0xff]  ;;  %v1565_v63 = vld [vmem:[#allocation2 + $0x68] sm:$0xff]  ;;  %v1564_v0 = vld [vmem:[#allocation2 + $0x60] sm:$0xff] }
 0x1fe   :  { %v1567_v1 = vld [vmem:[#allocation2 + $0x78] sm:$0xff]  ;;  %v1566_v2 = vld [vmem:[#allocation2 + $0x70] sm:$0xff]  ;;  %v1569_v3 = vld [vmem:[#allocation2 + $0x88] sm:$0xff] }
 0x1ff   :  { %1631 = vmatpush1.bf16.msra.mxu0 %v1554_v54  ;;  %v1568_v6 = vld [vmem:[#allocation2 + $0x80] sm:$0xff]  ;;  %v1571_v7 = vld [vmem:[#allocation2 + $0x98] sm:$0xff]  ;;  %v1570_v8 = vld [vmem:[#allocation2 + $0x90] sm:$0xff] }
 0x200   :  { %1632 = vmatprep.subr.bf16.mxu0 %v1557_v55  ;;  %v1573_v10 = vld [vmem:[#allocation2 + $0xa8] sm:$0xff]  ;;  %v1572_v11 = vld [vmem:[#allocation2 + $0xa0] sm:$0xff]  ;;  %v1575_v12 = vld [vmem:[#allocation2 + $0xb8] sm:$0xff] }
 0x201   :  { %v1574_v13 = vld [vmem:[#allocation2 + $0xb0] sm:$0xff]  ;;  %v1577_v17 = vld [vmem:[#allocation2 + $0xc8] sm:$0xff]  ;;  %v1576_v19 = vld [vmem:[#allocation2 + $0xc0] sm:$0xff] }
 0x202   :  { %v1579_v9 = vld [vmem:[#allocation2 + $0xd8] sm:$0xff]  ;;  %v1578_v4 = vld [vmem:[#allocation2 + $0xd0] sm:$0xff]  ;;  %v1581_v20 = vld [vmem:[#allocation2 + $0xe8] sm:$0xff] }
 0x203   :  { %1633 = vmatpush1.bf16.msra.mxu0 %v1556_v56  ;;  %v1580_v51 = vld [vmem:[#allocation2 + $0xe0] sm:$0xff]  ;;  %v1583_v21 = vld [vmem:[#allocation2 + $0xf8] sm:$0xff]  ;;  %v1582_v23 = vld [vmem:[#allocation2 + $0xf0] sm:$0xff] }
 0x204   :  { %1634 = vmatprep.subr.bf16.mxu0 %v1559_v57  ;;  %v1585_v24 = vld [vmem:[#allocation2 + $0x108] sm:$0xff]  ;;  %v1584_v29 = vld [vmem:[#allocation2 + $0x100] sm:$0xff]  ;;  %v1587_v30 = vld [vmem:[#allocation2 + $0x118] sm:$0xff] }
 0x205   :  { %v1586_v31 = vld [vmem:[#allocation2 + $0x110] sm:$0xff]  ;;  %v1589_v33 = vld [vmem:[#allocation2 + $0x128] sm:$0xff]  ;;  %v1588_v22 = vld [vmem:[#allocation2 + $0x120] sm:$0xff] }
 0x206   :  { %v1591_v28 = vld [vmem:[#allocation2 + $0x138] sm:$0xff]  ;;  %v1590_v27 = vld [vmem:[#allocation2 + $0x130] sm:$0xff]  ;;  %v1593_v32 = vld [vmem:[#allocation2 + $0x148] sm:$0xff] }
 0x207   :  { %1635 = vmatpush1.bf16.msra.mxu0 %v1558_v58  ;;  %v1592_v35 = vld [vmem:[#allocation2 + $0x140] sm:$0xff]  ;;  %v1595_v36 = vld [vmem:[#allocation2 + $0x158] sm:$0xff]  ;;  %v1594_v37 = vld [vmem:[#allocation2 + $0x150] sm:$0xff] }
 0x208   :  { %1636 = vmatprep.subr.bf16.mxu0 %v1561_v59  ;;  %v1597_v38 = vld [vmem:[#allocation2 + $0x168] sm:$0xff]  ;;  %v1596_v39 = vld [vmem:[#allocation2 + $0x160] sm:$0xff]  ;;  %v1599_v41 = vld [vmem:[#allocation2 + $0x178] sm:$0xff] }
 0x209   :  { %v1598_v42 = vld [vmem:[#allocation2 + $0x170] sm:$0xff]  ;;  %v1601_v43 = vld [vmem:[#allocation2 + $0x188] sm:$0xff]  ;;  %v1600_v46 = vld [vmem:[#allocation2 + $0x180] sm:$0xff] }
 0x20a   :  { %v1603_v47 = vld [vmem:[#allocation2 + $0x198] sm:$0xff]  ;;  %v1602_v48 = vld [vmem:[#allocation2 + $0x190] sm:$0xff]  ;;  %v1605_v50 = vld [vmem:[#allocation2 + $0x1a8] sm:$0xff] }
 0x20b   :  { %1637 = vmatpush1.bf16.msra.mxu0 %v1560_v60  ;;  %v1604_v5 = vld [vmem:[#allocation2 + $0x1a0] sm:$0xff]  ;;  %v1607_v52 = vld [vmem:[#allocation2 + $0x1b8] sm:$0xff]  ;;  %v1606_v34 = vld [vmem:[#allocation2 + $0x1b0] sm:$0xff] }
 0x20c   :  { %1638 = vmatprep.subr.bf16.mxu0 %v1563_v61  ;;  %v1609_v53 = vld [vmem:[#allocation2 + $0x1c8] sm:$0xff]  ;;  %v1608_v54 = vld [vmem:[#allocation2 + $0x1c0] sm:$0xff]  ;;  %v1611_v55 = vld [vmem:[#allocation2 + $0x1d8] sm:$0xff]  ;;  %v1550_v61 = vpack.c.bf16 %v1542_v49, %v1538_v44 }
 0x20d   :  { %v1610_v56 = vld [vmem:[#allocation2 + $0x1d0] sm:$0xff]  ;;  %v1613_v57 = vld [vmem:[#allocation2 + $0x1e8] sm:$0xff]  ;;  %v1612_v58 = vld [vmem:[#allocation2 + $0x1e0] sm:$0xff] }
 0x20e   :  { %v1615_v59 = vld [vmem:[#allocation2 + $0x1f8] sm:$0xff]  ;;  %v1614_v60 = vld [vmem:[#allocation2 + $0x1f0] sm:$0xff] }
 0x20f   :  { %1639 = vmatpush1.bf16.msra.mxu0 %v1562_v62  ;;  %v1616_v62 = vld [vmem:[%s2537_s4] sm:$0x3] }
 0x210   :  { %1640 = vmatprep.subr.bf16.mxu0 %v1565_v63  ;;  %v1621_v63 = vrot.slane %v1616_v62, %v270_v16 }
 0x213   :  { %1641 = vmatpush1.bf16.msra.mxu0 %v1564_v0  ;;  %v1625_v0 = vrot.slane %v1616_v62, %v274_v18 }
 0x214   :  { %1642 = vmatprep.subr.bf16.mxu0 %v1567_v1 }
 0x217   :  { %1643 = vmatpush1.bf16.msra.mxu0 %v1566_v2 }
 0x218   :  { %1644 = vmatprep.subr.bf16.mxu0 %v1569_v3 }
 0x21b   :  { %1645 = vmatpush1.bf16.msra.mxu0 %v1568_v6 }
 0x21c   :  { %1646 = vmatprep.subr.bf16.mxu0 %v1571_v7 }
 0x21f   :  { %1647 = vmatpush1.bf16.msra.mxu0 %v1570_v8 }
 0x220   :  { %1648 = vmatprep.subr.bf16.mxu0 %v1573_v10 }
 0x223   :  { %1649 = vmatpush1.bf16.msra.mxu0 %v1572_v11 }
 0x224   :  { %1650 = vmatprep.subr.bf16.mxu0 %v1575_v12 }
 0x227   :  { %1651 = vmatpush1.bf16.msra.mxu0 %v1574_v13 }
 0x228   :  { %1652 = vmatprep.subr.bf16.mxu0 %v1577_v17 }
 0x22b   :  { %1653 = vmatpush1.bf16.msra.mxu0 %v1576_v19 }
 0x22c   :  { %1654 = vmatprep.subr.bf16.mxu0 %v1579_v9 }
 0x22f   :  { %1655 = vmatpush1.bf16.msra.mxu0 %v1578_v4 }
 0x230   :  { %1656 = vmatprep.subr.bf16.mxu0 %v1581_v20 }
 0x233   :  { %1657 = vmatpush1.bf16.msra.mxu0 %v1580_v51 }
 0x234   :  { %1658 = vmatprep.subr.bf16.mxu0 %v1583_v21  ;;  %v1774_v21 = vand.u32 127, %v268_v14 }
 0x237   :  { %1659 = vmatpush1.bf16.msra.mxu0 %v1582_v23 }
 0x238   :  { %1671 = vmatprep.subr.bf16.mxu0 %v1585_v24  ;;  %v1777_v24 = vsub.s32 %v1774_v21, %v2478_v15 }
 0x23a   :  { %1661 = vmatmul.mubr.bf16.vlgmr.msra.gmra.mrb[4].mxu0 %v1548_v25 }
 0x23b   :  { %1672 = vmatpush1.bf16.msra.mxu0 %v1584_v29  ;;  %1703 = vmatprep.mubr.bf16.mxu0 %v1551_v26 }
 0x23c   :  { %1673 = vmatprep.subr.bf16.mxu0 %v1587_v30 }
 0x23f   :  { %1674 = vmatpush1.bf16.msra.mxu0 %v1586_v31 }
 0x240   :  { %1675 = vmatprep.subr.bf16.mxu0 %v1589_v33 }
 0x243   :  { %1676 = vmatpush1.bf16.msra.mxu0 %v1588_v22 }
 0x244   :  { %1677 = vmatprep.subr.bf16.mxu0 %v1591_v28 }
 0x247   :  { %1678 = vmatpush1.bf16.msra.mxu0 %v1590_v27 }
 0x248   :  { %1679 = vmatprep.subr.bf16.mxu0 %v1593_v32 }
 0x24b   :  { %1680 = vmatpush1.bf16.msra.mxu0 %v1592_v35 }
 0x24c   :  { %1681 = vmatprep.subr.bf16.mxu0 %v1595_v36 }
 0x24f   :  { %1682 = vmatpush1.bf16.msra.mxu0 %v1594_v37 }
 0x250   :  { %1683 = vmatprep.subr.bf16.mxu0 %v1597_v38 }
 0x253   :  { %1684 = vmatpush1.bf16.msra.mxu0 %v1596_v39 }
 0x254   :  { %1685 = vmatprep.subr.bf16.mxu0 %v1599_v41 }
 0x257   :  { %1686 = vmatpush1.bf16.msra.mxu0 %v1598_v42 }
 0x258   :  { %1687 = vmatprep.subr.bf16.mxu0 %v1601_v43 }
 0x25b   :  { %1688 = vmatpush1.bf16.msra.mxu0 %v1600_v46 }
 0x25c   :  { %1689 = vmatprep.subr.bf16.mxu0 %v1603_v47 }
 0x25f   :  { %1690 = vmatpush1.bf16.msra.mxu0 %v1602_v48 }
 0x260   :  { %1691 = vmatprep.subr.bf16.mxu0 %v1605_v50 }
 0x263   :  { %1692 = vmatpush1.bf16.msra.mxu0 %v1604_v5 }
 0x264   :  { %1693 = vmatprep.subr.bf16.mxu0 %v1607_v52 }
 0x267   :  { %1694 = vmatpush1.bf16.msra.mxu0 %v1606_v34 }
 0x268   :  { %1695 = vmatprep.subr.bf16.mxu0 %v1609_v53 }
 0x26b   :  { %1696 = vmatpush1.bf16.msra.mxu0 %v1608_v54 }
 0x26c   :  { %1697 = vmatprep.subr.bf16.mxu0 %v1611_v55 }
 0x26f   :  { %1698 = vmatpush1.bf16.msra.mxu0 %v1610_v56 }
 0x270   :  { %1699 = vmatprep.subr.bf16.mxu0 %v1613_v57 }
 0x273   :  { %1700 = vmatpush1.bf16.msra.mxu0 %v1612_v58 }
 0x274   :  { %1701 = vmatprep.subr.bf16.mxu0 %v1615_v59 }
 0x277   :  { %1702 = vmatpush1.bf16.msra.mxu0 %v1614_v60 }
 0x27a   :  { %1704 = vmatmul.mubr.bf16.vlgmr.msra.gmra.mrb[4].mxu0 %v1550_v61 }
 0x34d   :  { %v1705_v1 = vpop.f32.mrb[4].mxu0 }
 0x34e   :  { %v2029_v2 = vadd.f32 %v1705_v1, %v1621_v63  ;;  %v1707_v3 = vpop.f32.mrb[5].mxu0 }
 0x34f   :  { %v2030_v6 = vadd.f32 %v1707_v3, %v1625_v0  ;;  %v1709_v40 = vpop.f32.mrb[6].mxu0 }
 0x350   :  { %v1714_v7 = vmax.f32 %v2029_v2, 0.0  ;;  %v2031_v45 = vadd.f32 %v1709_v40, %v1621_v63  ;;  %v1711_v44 = vpop.f32.mrb[7].mxu0 }
 0x351   :  { %v1715_v49 = vmax.f32 %v2030_v6, 0.0  ;;  %v2032_v8 = vadd.f32 %v1711_v44, %v1625_v0 }
 0x352   :  { %v1718_v10 = vmul.f32 %v1714_v7, %v1714_v7  ;;  %v1716_v11 = vmax.f32 %v2031_v45, 0.0  ;;  %v1728_v51 = vpack.c.bf16 %v1714_v7, %v1714_v7 }
 0x353   :  { %v1719_v12 = vmul.f32 %v1715_v49, %v1715_v49  ;;  %v1717_v13 = vmax.f32 %v2032_v8, 0.0  ;;  %v1729_v17 = vpack.c.bf16 %v1715_v49, %v1715_v49 }
 0x354   :  { %v1723_v19 = vmul.f32 %v1716_v11, %v1716_v11  ;;  %v1730_v4 = vpack.c.bf16 %v1716_v11, %v1716_v11 }
 0x355   :  { %1764 = vmatprep.mubr.bf16.mxu1 %v1729_v17  ;;  %v1731_v16 = vpack.c.bf16 %v1717_v13, %v1717_v13  ;;  %v1724_v9 = vmul.f32 %v1717_v13, %v1717_v13  ;;  %v1720_v18 = vadd.f32 %v1719_v12, %v1718_v10 }
 0x357   :  { %1732 = vmatprep.subr.bf16.mxu1 %v1731_v16  ;;  %v1725_v20 = vadd.f32 %v1724_v9, %v1723_v19 }
 0x358   :  { %1733 = vmatpush1.bf16.xpose.msra.mxu1 %v1730_v4 }
 0x359   :  { %1726 = vadd.xlane.f32.xlu0 %v1725_v20 }
 0x35d   :  { %1721 = vadd.xlane.f32.xlu0 %v1720_v18 }
 0x35f   :  { %1765 = vmatmul.mubr.bf16.vlgmr.msra.gmra.mrb[8].mxu1 %v1728_v51 }
 0x3e6   :  { %v1727_v23 = vpop.xlane.xlu0 %1726 }
 0x3e7   :  { %v1778_v26 = vrot.slane %v1727_v23, %v1777_v24 }
 0x3ea   :  { %v1722_v25 = vpop.xlane.xlu0 %1721 }
 0x3eb   :  { %v1792_v30 = vadd.f32 %v1778_v26, %v1722_v25 }
 0x432   :  { %v1766_v29 = vpop.f32.mrb[8].mxu1 }
 0x433   :  { %v1793_v31 = vmul.f32 2.0, %v1766_v29  ;;  %v1768_v33 = vpop.f32.mrb[9].mxu1 }
 0x434   :  { %v1769_v22 = vpop.f32.mrb[10].mxu1 }
 0x435   :  { %v1794_v28 = vsub.f32 %v1792_v30, %v1793_v31  ;;  %v1770_v27 = vpop.f32.mrb[11].mxu1 }
 0x437   :  { %v1795_v32 = vmax.f32 %v1794_v28, 0.0 }
 0x439   :  { %2356 = vrsqrt.f32 %v1795_v32  ;;  %vm1798_vm0 = vcmp.eq.f32.partialorder %v1795_v32, inf  ;;  %v1801_v37 = vand.u32 2147483648, %v1795_v32  ;;  %vm1800_vm2 = vcmp.eq.f32.partialorder %v1795_v32, 0.0 }
 0x443   :  { %v2357_v35 = vpop.eup %2356 }
 0x444   :  { %v1797_v36 = vmul.f32 %v2357_v35, %v1795_v32 }
 0x446   :  { %v1799_v14 = vsel %vm1798_vm0, %v1795_v32, %v1797_v36 }
 0x447   :  { %v1802_v38 = vsel %vm1800_vm2, %v1801_v37, %v1799_v14 }
 0x448   :  { %1804 = vst.msk [vmem:[%s2538_s5] sm:$0xff] %vm1803_vm1, %v1802_v38 }
 0x449   :  { %1809 = vsyncpa [#allocation5], 1 }
 0x44a   :  { %1810 = vsyncmov [#allocation3] }
 0x44d   :  { %s1811_s8 = vpop.sfrf %1810 }
 0x44e   :  { %p2016_p8 = scmp.ne.s32.totalorder %s1811_s8, 0 }
 0x450   :  { %1815 = shalt.err (%p2016_p8)  }

</bundles_post_ra>
